<compile_context>
chip_gen: v6e
topology: v6e:2x2x1
jax: 0.10.0
libtpu: 0.0.40
codegen_flags: <defaults>
</compile_context>

<pallas_src>
import jax
import jax.numpy as jnp
from jax.experimental import pallas as pl
from jax.experimental.pallas import tpu as pltpu


# ----------------------------------------------------------------------------
# Kernels
# ----------------------------------------------------------------------------
def _linreg_row_kernel(x_ref, w_ref, b_ref, o_ref):
    # x_ref: (TB, D) VMEM  — current batch tile (native dtype, upcast here)
    # w_ref: (1,  D) VMEM  — resident weight row
    # b_ref: (1,)    SMEM  — scalar bias (f32)
    # o_ref: (1, TB) VMEM  — lane-dense output row for this tile
    x = x_ref[...].astype(jnp.float32)
    w = w_ref[...].astype(jnp.float32)
    s = jnp.sum(x * w, axis=-1)                     # VPU mul + row reduce
    o_ref[...] = (s + b_ref[0])[None, :].astype(o_ref.dtype)


def _make_dtiled_kernel(d_total):
    """Wide-D path: feature axis tiled on grid axis 1 with an f32 accumulator."""
    def kernel(x_ref, w_ref, b_ref, o_ref, acc_ref):
        k = pl.program_id(1)

        @pl.when(k == 0)
        def _init():
            acc_ref[...] = jnp.zeros_like(acc_ref)

        x = x_ref[...].astype(jnp.float32)          # (TB, TK)
        w = w_ref[...].astype(jnp.float32)          # (1,  TK)
        tk = x.shape[1]
        prod = x * w
        if d_total % tk != 0:
            # Mask the over-read (unspecified) tail of the last feature block.
            col = jax.lax.broadcasted_iota(jnp.int32, (1, tk), 1) + k * tk
            prod = jnp.where(col < d_total, prod, 0.0)
        acc_ref[...] += jnp.sum(prod, axis=-1)[None, :]

        @pl.when(k == pl.num_programs(1) - 1)
        def _finalize():
            o_ref[...] = (acc_ref[...] + b_ref[0]).astype(o_ref.dtype)

    return kernel


# ----------------------------------------------------------------------------
# Tiling heuristics
# ----------------------------------------------------------------------------
def _round_up(n, m):
    return ((n + m - 1) // m) * m


_TILE_BYTES = 2 * 1024 * 1024  # ~2 MiB of x per buffer (Pallas double-buffers)


def _pick_tiles(batch, d, itemsize):
    """Return (tb, tk): batch-rows and feature-cols per tile.

    tb targets ~2 MiB of x per buffer, floored to the sublane multiple for the
    streaming dtype (8 f32 / 16 bf16 / 32 int8) and to 128 when >= 128 so the
    (1, TB) output row stays lane-dense. tk == d unless even a minimal row
    tile exceeds the byte budget, in which case the feature axis is tiled.
    """
    row_mult = max(8, 32 // itemsize)
    bytes_per_row = d * itemsize

    if row_mult * bytes_per_row > _TILE_BYTES:
        # Wide-D fallback: minimal row tile, tile the feature axis instead.
        tb = row_mult
        tk = max(128, (_TILE_BYTES // (row_mult * itemsize)) // 128 * 128)
        tk = min(tk, d)
    else:
        tb = max(row_mult, _TILE_BYTES // max(1, bytes_per_row))
        tk = d

    # v7x: prefer >= 2 row tiles (when B allows) so the "parallel" grid axis
    # spans both TensorCores; harmless on single-TC v5e/v6e.
    if batch > row_mult:
        split_cap = max(row_mult, (pl.cdiv(batch, 2) // row_mult) * row_mult)
        tb = min(tb, split_cap)

    # Never larger than the sublane-rounded batch; keep nice multiples.
    tb = min(tb, _round_up(batch, row_mult))
    if tb >= 128:
        tb = (tb // 128) * 128
    else:
        tb = max(row_mult, (tb // row_mult) * row_mult)
    return tb, tk


# ----------------------------------------------------------------------------
# Wrapper
# ----------------------------------------------------------------------------
def linear_regression_forward(x, weight, bias, *, stream_dtype=None,
                              tile_rows=None):
    """x: (B, D); weight: (1, D) (PyTorch nn.Linear layout); bias: (1,).

    Returns jnp.squeeze of the (B, 1) linear output, matching the PyTorch
    module (shape (B,) for B > 1, scalar for B == 1). x / weight are streamed
    in their native dtype and upcast to f32 inside the kernel; pass
    stream_dtype=jnp.bfloat16 to explicitly halve HBM read traffic (pays one
    conversion pass, so only worthwhile if x is reused or already bf16).
    """
    B, D = x.shape
    if stream_dtype is not None:
        x = x.astype(stream_dtype)
        weight = weight.astype(stream_dtype)
    weight = weight.reshape(1, D)
    bias = jnp.asarray(bias, dtype=jnp.float32).reshape(1)

    itemsize = jnp.dtype(x.dtype).itemsize
    tb, tk = _pick_tiles(B, D, itemsize)
    if tile_rows is not None:
        tb = tile_rows
    num_tiles = pl.cdiv(B, tb)

    out_shape = jax.ShapeDtypeStruct((num_tiles, tb), jnp.float32)
    cost = pl.CostEstimate(
        flops=2 * B * D,
        transcendentals=0,
        bytes_accessed=B * D * itemsize
        + D * jnp.dtype(weight.dtype).itemsize
        + num_tiles * tb * 4,
    )

    if tk == D:
        # Common path: one (TB, D) x tile per grid step, weight resident.
        out = pl.pallas_call(
            _linreg_row_kernel,
            out_shape=out_shape,
            grid=(num_tiles,),
            in_specs=[
                pl.BlockSpec((tb, D), lambda i: (i, 0)),
                pl.BlockSpec((1, D), lambda i: (0, 0)),
                pl.BlockSpec(memory_space=pltpu.MemorySpace.SMEM),
            ],
            out_specs=pl.BlockSpec((1, tb), lambda i: (i, 0)),
            compiler_params=pltpu.CompilerParams(
                dimension_semantics=("parallel",)),
            cost_estimate=cost,
        )(x, weight, bias)
    else:
        # Wide-D path: second ("arbitrary") grid axis over feature blocks.
        num_k = pl.cdiv(D, tk)
        out = pl.pallas_call(
            _make_dtiled_kernel(D),
            out_shape=out_shape,
            grid=(num_tiles, num_k),
            in_specs=[
                pl.BlockSpec((tb, tk), lambda i, k: (i, k)),
                pl.BlockSpec((1, tk), lambda i, k: (0, k)),
                pl.BlockSpec(memory_space=pltpu.MemorySpace.SMEM),
            ],
            out_specs=pl.BlockSpec((1, tb), lambda i, k: (i, 0)),
            scratch_shapes=[pltpu.VMEM((1, tb), jnp.float32)],
            compiler_params=pltpu.CompilerParams(
                dimension_semantics=("parallel", "arbitrary")),
            cost_estimate=cost,
        )(x, weight, bias)

    # (num_tiles, TB) lane-dense slab -> flat -> drop tail rows (>= B, which
    # only ever saw their own over-read garbage) -> PyTorch-style .squeeze().
    y = out.reshape(-1)[:B]
    return jnp.squeeze(y)


if __name__ == "__main__":
    # Small shapes consistent with the module: batch=8, input_dim=32.
    B, D = 8, 32
    key = jax.random.PRNGKey(0)
    kx, kw, kb = jax.random.split(key, 3)

    x = jax.random.normal(kx, (B, D), dtype=jnp.float32)

    # Deterministic nn.Linear-style init: U(-1/sqrt(D), 1/sqrt(D))
    bound = 1.0 / (D ** 0.5)
    weight = jax.random.uniform(kw, (1, D), minval=-bound, maxval=bound,
                                dtype=jnp.float32)
    bias = jax.random.uniform(kb, (1,), minval=-bound, maxval=bound,
                              dtype=jnp.float32)

    y = linear_regression_forward(x, weight, bias)
    jax.block_until_ready(y)

    # Sanity check against plain-JAX reference.
    y_ref = jnp.squeeze(x @ weight.T + bias)
    assert y.shape == y_ref.shape
    assert jnp.allclose(y, y_ref, atol=1e-5, rtol=1e-5)

    print("KERNEL_OK")
</pallas_src>

<mosaic_0001>
module attributes {stable_mosaic.version = 11 : i64} {
  func.func @_linreg_row_kernel(%arg0: i32, %arg1: memref<8x32xf32, #tpu.memory_space<vmem>>, %arg2: memref<1x32xf32, #tpu.memory_space<vmem>>, %arg3: memref<1xf32, #tpu.memory_space<smem>>, %arg4: memref<1x8xf32, #tpu.memory_space<vmem>>) attributes {dimension_semantics = [#tpu.dimension_semantics<parallel>], iteration_bounds = array<i64: 1>, scalar_prefetch = 0 : i64, scratch_operands = 0 : i64, tpu.core_type = #tpu.core_type<tc>, window_params = [{transform_indices = @transform_0, window_bounds = array<i64: 8, 32>}, {pipeline_mode = #tpu.pipeline_mode<synchronous>, transform_indices = @transform_1, window_bounds = array<i64: 1, 32>}, {transform_indices = @transform_2, window_bounds = array<i64: 1>}, {transform_indices = @transform_3, window_bounds = array<i64: 1, 8>}]} {
    %c0 = arith.constant 0 : index
    %c0_0 = arith.constant 0 : index
    %0 = vector.load %arg1[%c0, %c0_0] : memref<8x32xf32, #tpu.memory_space<vmem>>, vector<8x32xf32>
    %c0_1 = arith.constant 0 : index
    %c0_2 = arith.constant 0 : index
    %1 = vector.load %arg2[%c0_1, %c0_2] : memref<1x32xf32, #tpu.memory_space<vmem>>, vector<1x32xf32>
    %2 = vector.broadcast %1 : vector<1x32xf32> to vector<8x32xf32>
    %3 = arith.mulf %0, %2 : vector<8x32xf32>
    %cst = arith.constant dense<0.000000e+00> : vector<8xf32>
    %4 = vector.multi_reduction <add>, %3, %cst [1] : vector<8x32xf32> to vector<8xf32>
    %c0_3 = arith.constant 0 : index
    %5 = memref.load %arg3[%c0_3] : memref<1xf32, #tpu.memory_space<smem>>
    %6 = vector.broadcast %5 : f32 to vector<8xf32>
    %7 = arith.addf %4, %6 : vector<8xf32>
    %8 = vector.shape_cast %7 : vector<8xf32> to vector<1x8xf32>
    %c0_4 = arith.constant 0 : index
    %c0_5 = arith.constant 0 : index
    %9 = vector.load %arg4[%c0_4, %c0_5] : memref<1x8xf32, #tpu.memory_space<vmem>>, vector<1x8xf32>
    tpu.vector_store %arg4[%c0_4, %c0_5], %8 {strides = array<i32>} : memref<1x8xf32, #tpu.memory_space<vmem>>, vector<1x8xf32>,
    return
  }
  func.func @transform_0(%arg0: i32) -> (i32, i32) {
    %c0_i32 = arith.constant 0 : i32
    %c0_i32_0 = arith.constant 0 : i32
    return %arg0, %c0_i32 : i32, i32
  }
  func.func @transform_1(%arg0: i32) -> (i32, i32) {
    %c0_i32 = arith.constant 0 : i32
    %c0_i32_0 = arith.constant 0 : i32
    %c0_i32_1 = arith.constant 0 : i32
    return %c0_i32, %c0_i32_0 : i32, i32
  }
  func.func @transform_2(%arg0: i32) -> i32 {
    %c0_i32 = arith.constant 0 : i32
    %c0_i32_0 = arith.constant 0 : i32
    return %c0_i32 : i32
  }
  func.func @transform_3(%arg0: i32) -> (i32, i32) {
    %c0_i32 = arith.constant 0 : i32
    %c0_i32_0 = arith.constant 0 : i32
    return %arg0, %c0_i32 : i32, i32
  }
}

</mosaic_0001>

<bundles_post_ra>
// kernel: tpu_custom_call.1
= control target key start
LH: loop header
LB: loop body
LE: loop exit
PB: predicated region body
PF: predicated region fallthrough
CT: control target
= control target key end

     0   :  { %9 = vsyncpa [#allocation4], 0  ;;  %s150_s0 = inlined_call_operand.hbm [shape: f32[8,32], index: 0, kind: input, shape index: {}]   ;;  %s151_s1 = inlined_call_operand.vmem [shape: f32[1,32], index: 1, kind: input, shape index: {}]   ;;  %s152_s2 = inlined_call_operand.<no memory space> [shape: f32[1], index: 2, kind: input, shape index: {}]   ;;  %s153_s3 = inlined_call_operand.hbm [shape: f32[1,8], index: 3, kind: output, shape index: {}]  }
   0x1   :  { %10 = vsyncpa [#allocation5], 0  ;;  %s116_s12 = smov [#allocation3]  }
   0x2   :  { %s17_s13 = sshll.u32 %s116_s12, 4  ;;  %s18_s13 = int_to_ptr.vmem [resolvable:$true] %s17_s13 }
   0x3   :  { %s80_s14 = scalar_lea.vmem %s18_s13, 128  ;;  %p85_p1 = scmp.lt.s32.totalorder %s18_s13, %s18_s13 }
   0x4   :  { %p81_p0 = scmp.ne.s32.totalorder %s18_s13, %s80_s14  ;;  %p86_p2 = scmp.lt.s32.totalorder %s80_s14, %s80_s14 }
   0x6   :  { %p87_p3 = por %p86_p2, %p85_p1 }
   0x8   :  { %p88_p4 = pnand %p87_p3, %p81_p0 }
   0xa   :  { %91 = shalt.err (!%p88_p4)
}
   0xb   :  { %20 = dma.hbm_to_vmem [thread:$0]  %s150_s0, 128, %s18_s13, [#allocation4]  }
   0xc   :  { %112 = dma.done.wait [#allocation4], 128  }
   0xd   :  { %113 = vsyncadd [#allocation4], 4294967168  ;;  %v28_v0 = vld [vmem:[#allocation3] sm:$0xff]  ;;  %vm37_vm0 = vcmask 261120   ;;  %v45_v4 = vlaneseq  ;;  %v42_v7 = vstv %s152_s2  ;;  %s117_s0 = smov [#allocation6]   ;;  %vm52_vm1 = vcmask 57344  }
   0xe   :  { %v69_v1 = vld [vmem:[%s151_s1] ss:$0 sm:$0xff]  ;;  %s60_s21 = sshll.u32 %s117_s0, 4  ;;  %s61_s21 = int_to_ptr.vmem [resolvable:$true] %s60_s21 }
   0xf   :  { %v36_v2 = vmul.f32 %v69_v1, %v28_v0  ;;  %v46_v5 = vand.u32 127, %v45_v4  ;;  %v48_v6 = vshrl.u32 %v45_v4, 7  ;;  %s92_s1 = scalar_lea.vmem %s61_s21, 16  ;;  %s96_s22 = scalar_lea.vmem %s61_s21, 32 }
  0x10   :  { %p93_p5 = scmp.ne.s32.totalorder %s61_s21, %s92_s1  ;;  %p97_p6 = scmp.lt.s32.totalorder %s61_s21, %s61_s21 }
  0x11   :  { %v38_v3 = vsel %vm37_vm0, %v36_v2, 0.0  ;;  %v49_v8 = vsub.s32 %v46_v5, %v48_v6  ;;  %p98_p7 = scmp.lt.s32.totalorder %s96_s22, %s92_s1 }
  0x12   :  { %39 = vadd.xlane.f32.xlu0 %v38_v3 }
  0x13   :  { %p99_p8 = por %p98_p7, %p97_p6 }
  0x15   :  { %p100_p9 = pnand %p99_p8, %p93_p5 }
  0x9b   :  { %v40_v9 = vpop.xlane.xlu0 %39 }
  0x9c   :  { %v43_v10 = vadd.f32 %v42_v7, %v40_v9 }
  0x9e   :  { %v50_v11 = vrot.slane %v43_v10, %v49_v8 }
  0xa0   :  { %53 = vst.msk [vmem:[#allocation6] sm:$0x1] %vm52_vm1, %v50_v11 }
  0xa1   :  { %103 = shalt.err (!%p100_p9)
}
  0xa2   :  { %63 = dma.vmem_to_hbm [thread:$0]  %s61_s21, 16, %s153_s3, [#allocation5]  }
  0xa3   :  { %114 = dma.done.wait [#allocation5], 16  }
  0xa4   :  { %115 = vsyncadd [#allocation5], 4294967280 }
  0xa5   :  { %67 = vsyncpa [#allocation4], 1 }
  0xa6   :  { %68 = vsyncpa [#allocation5], 1 }

</bundles_post_ra>
